<compile_context>
chip_gen: v5e
topology: v5e:2x2
jax: 0.10.0
libtpu: 0.0.40
codegen_flags: <defaults>
</compile_context>

<pallas_src>
import functools

import jax
import jax.numpy as jnp
from jax.experimental import pallas as pl
from jax.experimental.pallas import tpu as pltpu


def _make_kernel(with_spe, eps):
    def kernel(*refs):
        if with_spe:
            x_ref, w_ref, b_ref, spe_ref, res_ref, g_ref, beta_ref, o_ref = refs
        else:
            x_ref, w_ref, b_ref, res_ref, g_ref, beta_ref, o_ref = refs
            spe_ref = None

        # Dense: [tm, I] @ [I, H] on the MXU, f32 accumulation.  Operands
        # arrive already in the GEMM dtype (cast in the wrapper), so no
        # per-step convert of the grid-invariant weight happens here.
        h = jnp.dot(x_ref[...], w_ref[...], preferred_element_type=jnp.float32)
        h = h + b_ref[...].astype(jnp.float32)

        # Dropout is identity at inference time.
        # TODO(synk): training-mode dropout (stochastic mask) not implemented.

        if spe_ref is not None:
            h = h + spe_ref[...].astype(jnp.float32)
        h = h + res_ref[...].astype(jnp.float32)

        # LayerNorm over the hidden (last) axis, all in f32.
        mean = jnp.mean(h, axis=-1, keepdims=True)
        centered = h - mean
        var = jnp.mean(centered * centered, axis=-1, keepdims=True)
        inv = jax.lax.rsqrt(var + eps)
        out = (centered * inv * g_ref[...].astype(jnp.float32)
               + beta_ref[...].astype(jnp.float32))
        o_ref[...] = out.astype(o_ref.dtype)

    return kernel


@functools.lru_cache(maxsize=None)
def _supports_buffered():
    """One-time capability probe: pipeline_mode=pl.Buffered(1) constructs,
    lowers and runs.  Cached so the real kernel never pays a fallback
    re-trace and genuine lowering errors in the real kernel are not masked."""
    try:
        spec = pl.BlockSpec((8, 128), lambda i: (0, 0),
                            pipeline_mode=pl.Buffered(1))

        def k(x_ref, o_ref):
            o_ref[...] = x_ref[...]

        probe = pl.pallas_call(
            k,
            out_shape=jax.ShapeDtypeStruct((8, 128), jnp.float32),
            grid=(1,),
            in_specs=[spec],
            out_specs=pl.BlockSpec((8, 128), lambda i: (0, 0)),
        )
        jax.block_until_ready(probe(jnp.zeros((8, 128), jnp.float32)))
        return True
    except Exception:
        return False


@functools.lru_cache(maxsize=None)
def _vmem_capacity_bytes():
    try:
        cap = int(pltpu.get_tpu_info().vmem_capacity_bytes)
        if cap > 0:
            return cap
    except Exception:
        pass
    return 64 * 1024 * 1024  # conservative per-TensorCore budget (v7x)


def _const_spec(shape, single_buffer):
    # Grid-invariant block (index_map always (0, 0)); single-buffer it to save
    # VMEM when supported (the second pipeline buffer is pure waste here).
    if single_buffer:
        return pl.BlockSpec(shape, lambda i: (0, 0),
                            pipeline_mode=pl.Buffered(1))
    return pl.BlockSpec(shape, lambda i: (0, 0))


def layoutlmv2_output(hidden_states, input_tensor,
                      spatial_position_embeddings,
                      w_dense, b_dense, ln_gamma, ln_beta,
                      *, tm=512, gemm_dtype=jnp.bfloat16, eps=1e-12):
    """Fused dense + (optional spatial emb) + residual + LayerNorm.

    hidden_states: [T, I]; input_tensor / spatial emb: [T, H]; w_dense: [I, H].
    """
    T, I = hidden_states.shape
    H = w_dense.shape[1]
    with_spe = spatial_position_embeddings is not None
    out_dtype = hidden_states.dtype

    # --- dtype planning ----------------------------------------------------
    # Cast GEMM operands in the wrapper so the DMA moves the narrow dtype.
    if gemm_dtype is None:
        gemm_dtype = hidden_states.dtype
    x = hidden_states.astype(gemm_dtype)
    w = w_dense.astype(gemm_dtype)
    gemm_isz = jnp.dtype(gemm_dtype).itemsize

    res = input_tensor
    spe = spatial_position_embeddings
    stream_isz = jnp.dtype(res.dtype).itemsize
    out_isz = jnp.dtype(out_dtype).itemsize

    b2 = b_dense.reshape(1, H).astype(jnp.float32)
    g2 = ln_gamma.reshape(1, H).astype(jnp.float32)
    be2 = ln_beta.reshape(1, H).astype(jnp.float32)

    single_buffer_consts = _supports_buffered()
    w_bufs = 1 if single_buffer_consts else 2
    vmem_cap = _vmem_capacity_bytes()
    n_streams = 3 if with_spe else 2  # [T,H] streams: (spe), residual, output

    def vmem_need(t):
        return (w_bufs * I * H * gemm_isz            # dense weight (resident)
                + 2 * t * I * gemm_isz               # x tile (double-buffered)
                + 2 * (n_streams - 1) * t * H * stream_isz   # spe/res tiles
                + 2 * t * H * out_isz                # output tile
                + 2 * 3 * H * 4)                     # bias / gamma / beta

    # --- row-tile planning ---------------------------------------------------
    # Sublane granularity is dtype-aware (bf16 packs 16 rows/vreg).  The last
    # grid block may be partial (no jnp.pad).  Prefer >=2 grid steps so v7x's
    # two TensorCores both get work via the "parallel" axis.
    sub = 8 * max(1, 4 // gemm_isz)
    if tm >= T:
        tm = T
    else:
        tm = max(sub, (tm // sub) * sub)
    if T >= 2 * sub and pl.cdiv(T, tm) < 2:
        tm = max(sub, ((pl.cdiv(T, 2) + sub - 1) // sub) * sub)
    while vmem_need(tm) > (vmem_cap * 7) // 10 and tm > 2 * sub:
        tm = max(sub, ((tm // 2) // sub) * sub)

    grid = (pl.cdiv(T, tm),)
    vmem_limit = min(max(32 * 1024 * 1024, (vmem_need(tm) * 3) // 2),
                     (vmem_cap * 9) // 10)

    kernel = _make_kernel(with_spe, eps)

    # Scheduling hint with the actually-streamed dtypes.
    flops = 2 * T * I * H + 8 * T * H
    bytes_accessed = (T * I * gemm_isz + I * H * gemm_isz + 3 * H * 4
                      + (n_streams - 1) * T * H * stream_isz
                      + T * H * out_isz)
    cost = pl.CostEstimate(flops=int(flops), transcendentals=int(T),
                           bytes_accessed=int(bytes_accessed))

    in_specs = [pl.BlockSpec((tm, I), lambda i: (i, 0)),
                _const_spec((I, H), single_buffer_consts),
                _const_spec((1, H), single_buffer_consts)]
    inputs = [x, w, b2]
    if with_spe:
        in_specs.append(pl.BlockSpec((tm, H), lambda i: (i, 0)))
        inputs.append(spe)
    in_specs += [pl.BlockSpec((tm, H), lambda i: (i, 0)),
                 _const_spec((1, H), single_buffer_consts),
                 _const_spec((1, H), single_buffer_consts)]
    inputs += [res, g2, be2]

    return pl.pallas_call(
        kernel,
        out_shape=jax.ShapeDtypeStruct((T, H), out_dtype),
        grid_spec=pltpu.PrefetchScalarGridSpec(
            num_scalar_prefetch=0,
            grid=grid,
            in_specs=in_specs,
            out_specs=pl.BlockSpec((tm, H), lambda i: (i, 0)),
        ),
        compiler_params=pltpu.CompilerParams(
            dimension_semantics=("parallel",),
            vmem_limit_bytes=int(vmem_limit)),
        cost_estimate=cost,
    )(*inputs)


def reference(hidden_states, input_tensor, spe, w, b, gamma, beta, eps=1e-12):
    h = hidden_states @ w + b
    if spe is not None:
        h = h + spe
    h = h + input_tensor
    mean = jnp.mean(h, axis=-1, keepdims=True)
    var = jnp.mean((h - mean) ** 2, axis=-1, keepdims=True)
    return (h - mean) / jnp.sqrt(var + eps) * gamma + beta


if __name__ == "__main__":
    # config: intermediate_size=128, hidden_size=32; batch=2, seq=8
    B, S, I, H = 2, 8, 128, 32
    T = B * S

    key = jax.random.PRNGKey(0)
    ks = jax.random.split(key, 5)
    hidden_states = jax.random.normal(ks[0], (B, S, I), dtype=jnp.float32)
    input_tensor = jax.random.normal(ks[1], (B, S, H), dtype=jnp.float32)
    spe = jax.random.normal(ks[2], (B, S, H), dtype=jnp.float32)

    # Deterministic parameter init (nn.Linear-like scale), no checkpoint load.
    w_dense = jax.random.normal(ks[3], (I, H), dtype=jnp.float32) * (1.0 / I ** 0.5)
    b_dense = jax.random.normal(ks[4], (H,), dtype=jnp.float32) * 0.01
    ln_gamma = jnp.ones((H,), dtype=jnp.float32)
    ln_beta = jnp.zeros((H,), dtype=jnp.float32)

    x2 = hidden_states.reshape(T, I)
    res2 = input_tensor.reshape(T, H)
    spe2 = spe.reshape(T, H)

    ref = reference(hidden_states, input_tensor, spe, w_dense, b_dense,
                    ln_gamma, ln_beta)
    ref_nospe = reference(hidden_states, input_tensor, None, w_dense, b_dense,
                          ln_gamma, ln_beta)

    # Exactness check vs the f32 reference (f32 GEMM path), with spatial embs.
    out = layoutlmv2_output(
        x2, res2, spe2, w_dense, b_dense, ln_gamma, ln_beta,
        gemm_dtype=jnp.float32,
    ).reshape(B, S, H)
    jax.block_until_ready(out)
    assert jnp.allclose(out, ref, atol=1e-4, rtol=1e-4), "mismatch (f32, with spe)"

    # Without spatial position embeddings (no zeros tensor streamed).
    out_nospe = layoutlmv2_output(
        x2, res2, None, w_dense, b_dense, ln_gamma, ln_beta,
        gemm_dtype=jnp.float32,
    ).reshape(B, S, H)
    jax.block_until_ready(out_nospe)
    assert jnp.allclose(out_nospe, ref_nospe, atol=1e-4, rtol=1e-4), \
        "mismatch (f32, no spe)"

    # Default path: bf16 GEMM operands streamed as bf16, f32 accumulation and
    # f32 LayerNorm.  Sanity-checked against the f32 reference with a looser
    # tolerance (bf16 rounding of x / W only).
    out_bf16 = layoutlmv2_output(
        x2, res2, spe2, w_dense, b_dense, ln_gamma, ln_beta,
    ).reshape(B, S, H)
    jax.block_until_ready(out_bf16)
    assert jnp.allclose(out_bf16, ref, atol=3e-2, rtol=3e-2), \
        "mismatch (bf16 default)"

    print("KERNEL_OK")
</pallas_src>

<mosaic_0001>
module attributes {stable_mosaic.version = 11 : i64} {
  func.func @k(%arg0: i32, %arg1: memref<8x128xf32, #tpu.memory_space<vmem>>, %arg2: memref<8x128xf32, #tpu.memory_space<vmem>>) attributes {dimension_semantics = [#tpu.dimension_semantics<arbitrary>], iteration_bounds = array<i64: 1>, scalar_prefetch = 0 : i64, scratch_operands = 0 : i64, tpu.core_type = #tpu.core_type<tc>, window_params = [{pipeline_mode = #tpu.pipeline_mode<synchronous>, transform_indices = @transform_0, window_bounds = array<i64: 8, 128>}, {pipeline_mode = #tpu.pipeline_mode<synchronous>, transform_indices = @transform_1, window_bounds = array<i64: 8, 128>}]} {
    %c0 = arith.constant 0 : index
    %c0_0 = arith.constant 0 : index
    %0 = vector.load %arg1[%c0, %c0_0] : memref<8x128xf32, #tpu.memory_space<vmem>>, vector<8x128xf32>
    %c0_1 = arith.constant 0 : index
    %c0_2 = arith.constant 0 : index
    %1 = vector.load %arg2[%c0_1, %c0_2] : memref<8x128xf32, #tpu.memory_space<vmem>>, vector<8x128xf32>
    tpu.vector_store %arg2[%c0_1, %c0_2], %0 {strides = array<i32>} : memref<8x128xf32, #tpu.memory_space<vmem>>, vector<8x128xf32>,
    return
  }
  func.func @transform_0(%arg0: i32) -> (i32, i32) {
    %c0_i32 = arith.constant 0 : i32
    %c0_i32_0 = arith.constant 0 : i32
    %c0_i32_1 = arith.constant 0 : i32
    return %c0_i32, %c0_i32_0 : i32, i32
  }
  func.func @transform_1(%arg0: i32) -> (i32, i32) {
    %c0_i32 = arith.constant 0 : i32
    %c0_i32_0 = arith.constant 0 : i32
    %c0_i32_1 = arith.constant 0 : i32
    return %c0_i32, %c0_i32_0 : i32, i32
  }
}

module attributes {stable_mosaic.version = 11 : i64} {
  func.func @kernel(%arg0: i32, %arg1: memref<8x128xf32, #tpu.memory_space<vmem>>, %arg2: memref<128x32xf32, #tpu.memory_space<vmem>>, %arg3: memref<1x32xf32, #tpu.memory_space<vmem>>, %arg4: memref<8x32xf32, #tpu.memory_space<vmem>>, %arg5: memref<8x32xf32, #tpu.memory_space<vmem>>, %arg6: memref<1x32xf32, #tpu.memory_space<vmem>>, %arg7: memref<1x32xf32, #tpu.memory_space<vmem>>, %arg8: memref<8x32xf32, #tpu.memory_space<vmem>>) attributes {dimension_semantics = [#tpu.dimension_semantics<parallel>], iteration_bounds = array<i64: 2>, scalar_prefetch = 0 : i64, scratch_operands = 0 : i64, tpu.core_type = #tpu.core_type<tc>, window_params = [{transform_indices = @transform_0, window_bounds = array<i64: 8, 128>}, {pipeline_mode = #tpu.pipeline_mode<synchronous>, transform_indices = @transform_1, window_bounds = array<i64: 128, 32>}, {pipeline_mode = #tpu.pipeline_mode<synchronous>, transform_indices = @transform_2, window_bounds = array<i64: 1, 32>}, {transform_indices = @transform_3, window_bounds = array<i64: 8, 32>}, {transform_indices = @transform_4, window_bounds = array<i64: 8, 32>}, {pipeline_mode = #tpu.pipeline_mode<synchronous>, transform_indices = @transform_5, window_bounds = array<i64: 1, 32>}, {pipeline_mode = #tpu.pipeline_mode<synchronous>, transform_indices = @transform_6, window_bounds = array<i64: 1, 32>}, {transform_indices = @transform_7, window_bounds = array<i64: 8, 32>}]} {
    %c0 = arith.constant 0 : index
    %c0_0 = arith.constant 0 : index
    %0 = vector.load %arg1[%c0, %c0_0] : memref<8x128xf32, #tpu.memory_space<vmem>>, vector<8x128xf32>
    %c0_1 = arith.constant 0 : index
    %c0_2 = arith.constant 0 : index
    %1 = vector.load %arg2[%c0_1, %c0_2] : memref<128x32xf32, #tpu.memory_space<vmem>>, vector<128x32xf32>
    %cst = arith.constant dense<0.000000e+00> : vector<8x32xf32>
    %2 = tpu.matmul %0, %1, %cst {dimension_numbers = #tpu.dot_dimension_numbers<[1], [0], [0], [1], [0, 0, 1, 1], [], []>} : vector<8x128xf32>, vector<128x32xf32>, vector<8x32xf32> -> vector<8x32xf32>
    %c0_3 = arith.constant 0 : index
    %c0_4 = arith.constant 0 : index
    %3 = vector.load %arg3[%c0_3, %c0_4] : memref<1x32xf32, #tpu.memory_space<vmem>>, vector<1x32xf32>
    %4 = vector.broadcast %3 : vector<1x32xf32> to vector<8x32xf32>
    %5 = arith.addf %2, %4 : vector<8x32xf32>
    %c0_5 = arith.constant 0 : index
    %c0_6 = arith.constant 0 : index
    %6 = vector.load %arg4[%c0_5, %c0_6] : memref<8x32xf32, #tpu.memory_space<vmem>>, vector<8x32xf32>
    %7 = arith.addf %5, %6 : vector<8x32xf32>
    %c0_7 = arith.constant 0 : index
    %c0_8 = arith.constant 0 : index
    %8 = vector.load %arg5[%c0_7, %c0_8] : memref<8x32xf32, #tpu.memory_space<vmem>>, vector<8x32xf32>
    %9 = arith.addf %7, %8 : vector<8x32xf32>
    %cst_9 = arith.constant dense<0.000000e+00> : vector<8xf32>
    %10 = vector.multi_reduction <add>, %9, %cst_9 [1] : vector<8x32xf32> to vector<8xf32>
    %11 = vector.shape_cast %10 : vector<8xf32> to vector<8x1xf32>
    %cst_10 = arith.constant 3.200000e+01 : f32
    %12 = vector.broadcast %cst_10 : f32 to vector<8x1xf32>
    %13 = arith.divf %11, %12 : vector<8x1xf32>
    %14 = vector.broadcast %13 : vector<8x1xf32> to vector<8x32xf32>
    %15 = arith.subf %9, %14 : vector<8x32xf32>
    %16 = arith.mulf %15, %15 : vector<8x32xf32>
    %cst_11 = arith.constant dense<0.000000e+00> : vector<8xf32>
    %17 = vector.multi_reduction <add>, %16, %cst_11 [1] : vector<8x32xf32> to vector<8xf32>
    %18 = vector.shape_cast %17 : vector<8xf32> to vector<8x1xf32>
    %cst_12 = arith.constant 3.200000e+01 : f32
    %19 = vector.broadcast %cst_12 : f32 to vector<8x1xf32>
    %20 = arith.divf %18, %19 : vector<8x1xf32>
    %cst_13 = arith.constant 9.99999996E-13 : f32
    %21 = vector.broadcast %cst_13 : f32 to vector<8x1xf32>
    %22 = arith.addf %20, %21 : vector<8x1xf32>
    %23 = math.rsqrt %22 : vector<8x1xf32>
    %24 = vector.broadcast %23 : vector<8x1xf32> to vector<8x32xf32>
    %25 = arith.mulf %15, %24 : vector<8x32xf32>
    %c0_14 = arith.constant 0 : index
    %c0_15 = arith.constant 0 : index
    %26 = vector.load %arg6[%c0_14, %c0_15] : memref<1x32xf32, #tpu.memory_space<vmem>>, vector<1x32xf32>
    %27 = vector.broadcast %26 : vector<1x32xf32> to vector<8x32xf32>
    %28 = arith.mulf %25, %27 : vector<8x32xf32>
    %c0_16 = arith.constant 0 : index
    %c0_17 = arith.constant 0 : index
    %29 = vector.load %arg7[%c0_16, %c0_17] : memref<1x32xf32, #tpu.memory_space<vmem>>, vector<1x32xf32>
    %30 = vector.broadcast %29 : vector<1x32xf32> to vector<8x32xf32>
    %31 = arith.addf %28, %30 : vector<8x32xf32>
    %c0_18 = arith.constant 0 : index
    %c0_19 = arith.constant 0 : index
    %32 = vector.load %arg8[%c0_18, %c0_19] : memref<8x32xf32, #tpu.memory_space<vmem>>, vector<8x32xf32>
    tpu.vector_store %arg8[%c0_18, %c0_19], %31 {strides = array<i32>} : memref<8x32xf32, #tpu.memory_space<vmem>>, vector<8x32xf32>,
    return
  }
  func.func @transform_0(%arg0: i32) -> (i32, i32) {
    %c0_i32 = arith.constant 0 : i32
    %c0_i32_0 = arith.constant 0 : i32
    return %arg0, %c0_i32 : i32, i32
  }
  func.func @transform_1(%arg0: i32) -> (i32, i32) {
    %c0_i32 = arith.constant 0 : i32
    %c0_i32_0 = arith.constant 0 : i32
    %c0_i32_1 = arith.constant 0 : i32
    return %c0_i32, %c0_i32_0 : i32, i32
  }
  func.func @transform_2(%arg0: i32) -> (i32, i32) {
    %c0_i32 = arith.constant 0 : i32
    %c0_i32_0 = arith.constant 0 : i32
    %c0_i32_1 = arith.constant 0 : i32
    return %c0_i32, %c0_i32_0 : i32, i32
  }
  func.func @transform_3(%arg0: i32) -> (i32, i32) {
    %c0_i32 = arith.constant 0 : i32
    %c0_i32_0 = arith.constant 0 : i32
    return %arg0, %c0_i32 : i32, i32
  }
  func.func @transform_4(%arg0: i32) -> (i32, i32) {
    %c0_i32 = arith.constant 0 : i32
    %c0_i32_0 = arith.constant 0 : i32
    return %arg0, %c0_i32 : i32, i32
  }
  func.func @transform_5(%arg0: i32) -> (i32, i32) {
    %c0_i32 = arith.constant 0 : i32
    %c0_i32_0 = arith.constant 0 : i32
    %c0_i32_1 = arith.constant 0 : i32
    return %c0_i32, %c0_i32_0 : i32, i32
  }
  func.func @transform_6(%arg0: i32) -> (i32, i32) {
    %c0_i32 = arith.constant 0 : i32
    %c0_i32_0 = arith.constant 0 : i32
    %c0_i32_1 = arith.constant 0 : i32
    return %c0_i32, %c0_i32_0 : i32, i32
  }
  func.func @transform_7(%arg0: i32) -> (i32, i32) {
    %c0_i32 = arith.constant 0 : i32
    %c0_i32_0 = arith.constant 0 : i32
    return %arg0, %c0_i32 : i32, i32
  }
}

</mosaic_0001>

<bundles_post_ra>
// kernel: tpu_custom_call.1
= control target key start
LH: loop header
LB: loop body
LE: loop exit
PB: predicated region body
PF: predicated region fallthrough
CT: control target
= control target key end

     0   :  { %6 = vsyncpa [#allocation3], 0  ;;  %s114_s0 = inlined_call_operand.hbm [shape: f32[8,128], index: 0, kind: input, shape index: {}]   ;;  %s115_s1 = inlined_call_operand.hbm [shape: f32[8,128], index: 1, kind: output, shape index: {}]  }
   0x1   :  { %7 = vsyncpa [#allocation4], 0  ;;  %s13_s8 = sshll.u32 %s114_s0, 4  ;;  %s96_s9 = smov [#allocation2]   ;;  %s14_s8 = int_to_ptr.hbm [resolvable:$true] %s13_s8 }
   0x2   :  { %s15_s10 = sshll.u32 %s96_s9, 4  ;;  %s16_s10 = int_to_ptr.vmem [resolvable:$true] %s15_s10 }
   0x3   :  { %18 = dma.hbm_to_vmem [thread:$0]  %s14_s8, 128, %s16_s10, [#allocation3]  }
   0x4   :  { %92 = dma.done.wait [#allocation3], 128  }
   0x5   :  { %93 = vsyncadd [#allocation3], 4294967168  ;;  %s97_s11 = smov [#allocation5]   ;;  %s32_s15 = sshll.u32 %s115_s1, 4  ;;  %v23_v0 = vld [vmem:[#allocation2] sm:$0xff]  ;;  %s33_s15 = int_to_ptr.hbm [resolvable:$true] %s32_s15 }
   0x6   :  { %s30_s12 = sshll.u32 %s97_s11, 4  ;;  %24 = vst [vmem:[#allocation5] sm:$0xff] %v23_v0  ;;  %s31_s12 = int_to_ptr.vmem [resolvable:$true] %s30_s12 }
   0x7   :  { %35 = dma.vmem_to_hbm [thread:$0]  %s31_s12, 128, %s33_s15, [#allocation4]  }
   0x8   :  { %94 = dma.done.wait [#allocation4], 128  }
   0x9   :  { %95 = vsyncadd [#allocation4], 4294967168 }
   0xa   :  { %40 = vsyncpa [#allocation3], 1 }
   0xb   :  { %41 = vsyncpa [#allocation4], 1 }

// kernel: tpu_custom_call.1
= control target key start
LH: loop header
LB: loop body
LE: loop exit
PB: predicated region body
PF: predicated region fallthrough
CT: control target
= control target key end

     0   :  { %12 = vsyncpa [#allocation3], 0  ;;  %s808_s0 = inlined_call_operand.vmem [shape: f32[16,128], index: 0, kind: input, shape index: {}]   ;;  %s809_s1 = inlined_call_operand.vmem [shape: f32[128,32], index: 1, kind: input, shape index: {}]   ;;  %s810_s2 = inlined_call_operand.vmem [shape: f32[1,32], index: 2, kind: input, shape index: {}]   ;;  %s811_s3 = inlined_call_operand.vmem [shape: f32[16,32], index: 3, kind: input, shape index: {}]   ;;  %s812_s4 = inlined_call_operand.vmem [shape: f32[16,32], index: 4, kind: input, shape index: {}]   ;;  %s813_s5 = inlined_call_operand.vmem [shape: f32[1,32], index: 5, kind: input, shape index: {}]   ;;  %s814_s6 = inlined_call_operand.vmem [shape: f32[1,32], index: 6, kind: input, shape index: {}]   ;;  %s815_s7 = inlined_call_operand.hbm [shape: f32[16,32], index: 7, kind: output, shape index: {}]  }
   0x1   :  { %14 = vsyncpa [#allocation3 + $0x1], 0  ;;  %s657_s24 = smov 0   ;;  %s659_s25 = smov 0  }
   0x2   :  { %s661_s26 = smov 0   ;;  %s663_s27 = smov 0  }
   0x3 LB: > { %s678_s28 = sadd.s32 4294967295, %s614_s27   ;;  %s493_s29 = sadd.s32 4294967294, %s614_s27   ;;  %s614_s27 = sphi %s663_s27, %s821_s27   ;;  %s610_s26 = sphi %s661_s26, %s820_s26   ;;  %s606_s25 = sphi %s659_s25, %s819_s25   ;;  %s602_s24 = sphi %s657_s24, %s818_s24  }
   0x4   : > { %s682_s30 = sadd.s32 1, %s614_s27   ;;  %s189_s8 = sadd.s32 1, %s610_s26 }
   0x5   : > { %s186_s9 = ssub.s32 %s614_s27, %s682_s30  ;;  %p199_p0 = scmp.ne.s32.totalorder %s610_s26, %s606_s25 }
   0x6   : > { %p187_p1 = scmp.eq.s32.totalorder %s186_s9, 0  ;;  %p200_p2 = scmp.eq.s32.totalorder %s678_s28, 1 }
   0x7   : > { %p205_p3 = scmp.ne.s32.totalorder %s606_s25, %s602_s24  ;;  %p206_p4 = scmp.eq.s32.totalorder %s493_s29, 1 }
   0x8   : > { %s693_s10 = scalar_select %p187_p1, %s610_s26, %s189_s8  }
   0x9   : > { %p695_p5 = por %p200_p2, %p199_p0  ;;  %p699_p6 = por %p206_p4, %p205_p3 }
   0xa   : > { %p496_p7 = scmp.ge.s32.totalorder %s614_s27, 1  ;;  %p257_p8 = scmp.lt.s32.totalorder %s614_s27, 3 }
   0xc   : > { %p258_p9 = pnand %p496_p7, %p257_p8 }
   0xd   : > { %p296_p10 = scmp.lt.s32.totalorder (!%p258_p9), %s678_s28, 1  ;;  %s502_s18 = sshll.u32 (!%p258_p9), %s678_s28, 3 }
   0xe   : > { %261 = sbr.rel (%p258_p9) target bundleno = 454 (0x1c6), region = 48  ;;  %s405_s23 = scalar_lea.hbm (!%p258_p9), %s815_s7, %s502_s18 }
   0xf   : > { %s409_s14 = sshll.u32 (!%p258_p9), %s405_s23, 4  ;;  %s410_s14 = int_to_ptr.hbm [resolvable:$true] %s409_s14 }
  0x13   : > { %v324_v0 = vld [vmem:[%s809_s1 + $0x78] sm:$0xff]  ;;  %v323_v1 = vld [vmem:[%s809_s1 + $0x70] sm:$0xff]  ;;  %v322_v2 = vld [vmem:[%s809_s1 + $0x68] sm:$0xff]  ;;  %s297_s21 = scalar_select %p296_p10, %s678_s28, 1  ;;  %vm353_vm0 = vcmask 261120   ;;  %v616_v25 = vmov 32.0  }
  0x14   : > { %329 = vmatpush.msra.mxu0 %v324_v0  ;;  %v321_v3 = vld [vmem:[%s809_s1 + $0x60] sm:$0xff]  ;;  %v320_v4 = vld [vmem:[%s809_s1 + $0x58] sm:$0xff]  ;;  %v319_v5 = vld [vmem:[%s809_s1 + $0x50] sm:$0xff]  ;;  %548 = vrcp.f32 %v616_v25 }
  0x15   : > { %v318_v6 = vld [vmem:[%s809_s1 + $0x48] sm:$0xff]  ;;  %v317_v7 = vld [vmem:[%s809_s1 + $0x40] sm:$0xff]  ;;  %v316_v8 = vld [vmem:[%s809_s1 + $0x38] sm:$0xff]  ;;  %s498_s9 = sshll.u32 %s297_s21, 3 }
  0x16   : > { %330 = vmatpush.msra.mxu0 %v323_v1  ;;  %v315_v9 = vld [vmem:[%s809_s1 + $0x30] sm:$0xff]  ;;  %v314_v10 = vld [vmem:[%s809_s1 + $0x28] sm:$0xff]  ;;  %v313_v11 = vld [vmem:[%s809_s1 + $0x20] sm:$0xff]  ;;  %s299_s19 = scalar_lea.vmem %s808_s0, %s498_s9  ;;  %s303_s29 = scalar_lea.vmem %s811_s3, %s498_s9 }
  0x17   : > { %v312_v12 = vld [vmem:[%s809_s1 + $0x18] sm:$0xff]  ;;  %v311_v13 = vld [vmem:[%s809_s1 + $0x10] sm:$0xff]  ;;  %v310_v14 = vld [vmem:[%s809_s1 + $0x8] sm:$0xff]  ;;  %s307_s16 = scalar_lea.vmem %s812_s4, %s498_s9  ;;  %s293_s9 = sand.u32 1, %s606_s25  }
  0x18   : > { %331 = vmatpush.msra.mxu0 %v322_v2  ;;  %v309_v15 = vld [vmem:[%s809_s1] sm:$0xff]  ;;  %s497_s17 = sshll.u32 %s293_s9, 3  ;;  %s395_s15 = scalar_lea.sflag [#allocation3], %s293_s9 }
  0x19   : > { %v308_v16 = vld [vmem:[%s299_s19] sm:$0xff]  ;;  %s295_s13 = scalar_lea.vmem [#allocation2], %s497_s17  ;;  %s572_s17 = scalar_lea.hbm %s815_s7, 16 }
  0x1a   : > { %332 = vmatpush.msra.mxu0 %v321_v3  ;;  %v545_v17 = vld [vmem:[%s810_s2] ss:$0 sm:$0xff]  ;;  %v549_v26 = vpop.eup %548  ;;  %s407_s28 = sshll.u32 %s295_s13, 4  ;;  %s408_s28 = int_to_ptr.vmem [resolvable:$true] %s407_s28 }
  0x1b   : > { %v349_v19 = vld [vmem:[%s303_s29] sm:$0xff]  ;;  %v358_v27 = vmul.f32 32.0, %v549_v26  ;;  %vm362_vm1 = vweird.f32 %v549_v26 }
  0x1c   : > { %333 = vmatpush.msra.mxu0 %v320_v4  ;;  %v351_v21 = vld [vmem:[%s307_s16] sm:$0xff]  ;;  %s566_s16 = sshra.s32 %s410_s14, 4  ;;  %s567_s16 = int_to_ptr.hbm [resolvable:$true] %s566_s16 }
  0x1d   : > { %v359_v28 = vsub.f32 1.0, %v358_v27  ;;  %v546_v46 = vld [vmem:[%s813_s5] ss:$0 sm:$0xff]  ;;  %s568_s18 = scalar_lea.hbm %s567_s16, 8  ;;  %p573_p0 = scmp.lt.s32.totalorder %s567_s16, %s815_s7 }
  0x1e   : > { %334 = vmatpush.msra.mxu0 %v319_v5  ;;  %v547_v49 = vld [vmem:[%s814_s6] ss:$0 sm:$0xff]  ;;  %p569_p11 = scmp.ne.s32.totalorder %s567_s16, %s568_s18  ;;  %p574_p1 = scmp.lt.s32.totalorder %s572_s17, %s568_s18 }
  0x1f   : > { %v360_v29 = vmul.f32 %v549_v26, %v359_v28 }
  0x20   : > { %335 = vmatpush.msra.mxu0 %v318_v6  ;;  %p570_p12 = pnand %p569_p11, %p695_p5  ;;  %p575_p2 = por %p574_p1, %p573_p0 }
  0x21   : > { %v361_v30 = vadd.f32 %v549_v26, %v360_v29 }
  0x22   : > { %336 = vmatpush.msra.mxu0 %v317_v7  ;;  %p571_p13 = pneg %p570_p12 }
  0x23   : > { %v363_v31 = vsel %vm362_vm1, %v549_v26, %v361_v30 }
  0x24   : > { %337 = vmatpush.msra.mxu0 %v316_v8  ;;  %p576_p3 = pnand %p575_p2, %p571_p13 }
  0x26   : > { %338 = vmatpush.msra.mxu0 %v315_v9 }
  0x28   : > { %339 = vmatpush.msra.mxu0 %v314_v10 }
  0x2a   : > { %340 = vmatpush.msra.mxu0 %v313_v11 }
  0x2c   : > { %341 = vmatpush.msra.mxu0 %v312_v12 }
  0x2e   : > { %342 = vmatpush.msra.mxu0 %v311_v13 }
  0x30   : > { %343 = vmatpush.msra.mxu0 %v310_v14 }
  0x32   : > { %344 = vmatpush.msra.mxu0 %v309_v15 }
  0x33   : > { %345 = vmatmul.f32.vlgmr.msra.gmra.mxu0 %v308_v16 }
  0xb0   : > { %v346_v18 = vpop.f32.mrf.mxu0 }
  0xb1   : > { %v347_v20 = vadd.f32 %v545_v17, %v346_v18 }
  0xb3   : > { %v350_v22 = vadd.f32 %v349_v19, %v347_v20 }
  0xb5   : > { %v352_v23 = vadd.f32 %v351_v21, %v350_v22 }
  0xb7   : > { %v354_v24 = vsel %vm353_vm0, %v352_v23, 0.0 }
  0xb8   : > { %355 = vadd.xlane.f32.xlu0 %v354_v24 }
 0x12b   : > { %v356_v32 = vpop.xlane.xlu0 %355 }
 0x12c   : > { %v364_v33 = vmul.f32 %v363_v31, %v356_v32 }
 0x12e   : > { %v365_v34 = vsub.f32 %v352_v23, %v364_v33 }
 0x130   : > { %v366_v35 = vmul.f32 %v365_v34, %v365_v34 }
 0x132   : > { %v367_v36 = vsel %vm353_vm0, %v366_v35, 0.0 }
 0x133   : > { %368 = vadd.xlane.f32.xlu0 %v367_v36 }
 0x1a6   : > { %v369_v37 = vpop.xlane.xlu0 %368 }
 0x1a7   : > { %v370_v38 = vmul.f32 %v369_v37, %v363_v31 }
 0x1a9   : > { %v371_v39 = vadd.f32 1e-12, %v370_v38 }
 0x1ab   : > { %550 = vrsqrt.f32 %v371_v39  ;;  %vm378_vm3 = vweird.f32 %v371_v39 }
 0x1b1   : > { %v551_v40 = vpop.eup %550 }
 0x1b2   : > { %v373_v41 = vmul.f32 %v551_v40, %v371_v39  ;;  %vm379_vm2 = vweird.f32 %v551_v40 }
 0x1b3   : > { %vm380_vm4 = vmor %vm378_vm3, %vm379_vm2 }
 0x1b4   : > { %v374_v42 = vmul.f32 %v551_v40, %v373_v41 }
 0x1b6   : > { %v375_v43 = vmul.f32 0.5, %v374_v42 }
 0x1b8   : > { %v376_v44 = vsub.f32 1.5, %v375_v43 }
 0x1ba   : > { %v377_v45 = vmul.f32 %v551_v40, %v376_v44 }
 0x1bc   : > { %v381_v47 = vsel %vm380_vm4, %v551_v40, %v377_v45 }
 0x1bd   : > { %v382_v48 = vmul.f32 %v381_v47, %v365_v34 }
 0x1bf   : > { %v387_v50 = vmul.f32 %v546_v46, %v382_v48 }
 0x1c1   : > { %v392_v51 = vadd.f32 %v547_v49, %v387_v50 }
 0x1c3   : > { %393 = vst.msk [vmem:[%s295_s13] sm:$0xff] %vm353_vm0, %v392_v51 }
 0x1c4   : > { %579 = shalt.err (!%p576_p3)
}
 0x1c5   : > { %505 = dma.vmem_to_hbm [thread:$0]  (%p695_p5), %s408_s28, 128, %s410_s14, %s395_s15  }
 0x1c6 PF: > { %p511_p4 = scmp.ge.s32.totalorder %s614_s27, 2  ;;  %s421_s9 = sand.u32 1, %s602_s24  }
 0x1c7   : > { %s422_s23 = scalar_lea.sflag [#allocation3], %s421_s9 }
 0x1c8   : > { %p508_p7 = pnand %p511_p4, %p699_p6 }
 0x1ca   : > { %p509_p8 = pneg %p508_p7 }
 0x1cc   : > { %597 = dma.done.wait (%p509_p8), %s422_s23, 128  }
 0x1cd   : > { %599 = vsyncadd (%p509_p8), %s422_s23, 4294967168  ;;  %p17_p9 = scmp.ge.s32.totalorder %s682_s30, 4   ;;  %s818_s24 = smov %s606_s25 }
 0x1ce   : > { %s819_s25 = smov %s610_s26  ;;  %s820_s26 = smov %s693_s10 }
 0x1cf   : > { %s821_s27 = smov %s682_s30  ;;  %19 = sbr.rel (!%p17_p9) target bundleno = 3 (0x3), region = 89 }
 0x1d4   :  { %428 = vsyncpa [#allocation3], 1 }
 0x1d5   :  { %430 = vsyncpa [#allocation3 + $0x1], 1 }

</bundles_post_ra>
